<compile_context>
chip_gen: v6e
topology: v6e:2x2x1
jax: 0.10.0
libtpu: 0.0.40
codegen_flags: <defaults>
</compile_context>

<pallas_src>
import jax
import jax.numpy as jnp
from jax import lax
from jax.experimental import pallas as pl
from jax.experimental.pallas import tpu as pltpu

_INV_SQRT2 = 0.7071067811865476
_LANE = 128
_MAX_NB = 8          # cap on images folded into one grid step (static unroll)
_HID_CHUNK = 512     # block the hidden dim above this (bounds f32 intermediate)
_MAX_COLS = 8192     # cap on pixel columns processed per grid step


def _gelu_exact(x):
    # torch.nn.GELU default is the exact (erf) formulation.
    return 0.5 * x * (1.0 + lax.erf(x * _INV_SQRT2))


def _make_kernel(nb, hid, hid_chunk):
    single = hid <= hid_chunk

    def kernel(x_ref, w1_ref, b1_ref, w2_ref, b2_ref, o_ref):
        c_out, t_hw = o_ref.shape[1], o_ref.shape[2]
        b2 = b2_ref[...]                               # (C_out, 1)
        for b in range(nb):                            # static unroll, nb <= _MAX_NB
            x = x_ref[b]                               # (C_in, T_HW) lane-dense slab
            if single:
                h = jnp.dot(w1_ref[...], x, preferred_element_type=jnp.float32)
                h = _gelu_exact(h + b1_ref[...])
                y = jnp.dot(w2_ref[...], h, preferred_element_type=jnp.float32)
            else:
                # Hidden-dim blocking: bounds the live f32 (chunk, T_HW)
                # intermediate and lets the second matmul overlap GELU.
                y = jnp.zeros((c_out, t_hw), jnp.float32)
                for c0 in range(0, hid, hid_chunk):    # static unroll
                    c1 = min(c0 + hid_chunk, hid)
                    h = jnp.dot(w1_ref[c0:c1, :], x,
                                preferred_element_type=jnp.float32)
                    h = _gelu_exact(h + b1_ref[c0:c1, :])
                    y = y + jnp.dot(w2_ref[:, c0:c1], h,
                                    preferred_element_type=jnp.float32)
            o_ref[b] = (y + b2).astype(o_ref.dtype)

    return kernel


def _vmem_budget_bytes():
    try:
        cap = int(pltpu.get_tpu_info().vmem_capacity_bytes)
    except Exception:
        cap = 64 << 20            # v7x per-TensorCore floor; safe everywhere
    return (cap * 3) // 4         # leave headroom for compiler scratch


def _plan(n, c_in, c_out, hid, hw, act_bytes, budget):
    """Pick (nb, t_hw, hid_blk): images folded per step and pixel-tile width."""
    hid_blk = min(hid, _HID_CHUNK)
    # Live bytes per pixel column per folded image in one grid step:
    # double-buffered x/out slabs (streaming dtype) + f32 hidden chunk + f32 acc.
    per_col = 2 * act_bytes * (c_in + c_out) + 4 * (hid_blk + c_out)
    # Constant params (worst case double-buffered) + fixed slack.
    const_bytes = 2 * 4 * (hid * c_in + c_out * hid + hid + c_out) + (2 << 20)
    cols_budget = max(_LANE, (budget - const_bytes) // max(per_col, 1))

    if hw <= min(cols_budget, _MAX_COLS):
        # Whole image per step: fold several batch images into one step.
        t_hw = hw
        per_img = per_col * hw
        nb = max(1, min(n, _MAX_NB, (budget - const_bytes) // max(per_img, 1)))
        if n > 1:
            nb = min(nb, -(-n // 2))   # keep >= 2 grid steps (both v7x cores busy)
    else:
        # Tile the pixel axis with the fattest lane-dense tile the budget allows.
        nb = 1
        t_hw = max(_LANE, (min(cols_budget, _MAX_COLS) // _LANE) * _LANE)

    # If the grid would collapse to a single step (n == 1, one pixel tile),
    # split the pixel axis so both v7x TensorCores get a "parallel" slice.
    if n == 1 and -(-hw // t_hw) < 2 and hw >= 2 * _LANE:
        t_hw = max(_LANE, ((-(-hw // 2)) // _LANE) * _LANE)

    return nb, t_hw, hid_blk


@jax.jit
def cmlp_forward(x_nchw, w1, b1, w2, b2):
    """x_nchw: (N, C_in, H, W).
    w1: (Hid, C_in)  [= fc1.weight[:, :, 0, 0]],  b1: (Hid,)
    w2: (C_out, Hid) [= fc2.weight[:, :, 0, 0]],  b2: (C_out,)
    Returns (N, C_out, H, W)."""
    n, c_in, h, w = x_nchw.shape
    hid = w1.shape[0]
    c_out = w2.shape[0]
    hw = h * w

    act_bytes = jnp.dtype(x_nchw.dtype).itemsize
    budget = _vmem_budget_bytes()
    nb, t_hw, hid_blk = _plan(n, c_in, c_out, hid, hw, act_bytes, budget)
    b_tiles = pl.cdiv(n, nb)
    s_tiles = pl.cdiv(hw, t_hw)

    # Free (no-copy) views: trailing-dim reshape keeps the NCHW layout intact.
    x3d = x_nchw.reshape(n, c_in, hw)
    b1_2d = b1.reshape(hid, 1)
    b2_2d = b2.reshape(c_out, 1)

    rows = n * hw
    cost = pl.CostEstimate(
        flops=2 * rows * (c_in * hid + hid * c_out),
        transcendentals=rows * hid,
        bytes_accessed=act_bytes * rows * (c_in + c_out)
        + 4 * (c_in * hid + hid * c_out + hid + c_out),
    )

    # VMEM sized to the actual buffers (x2 slack), capped at ~75% of physical
    # VMEM for the current generation (honest on v7x's 64 MiB per TC).
    vmem_needed = (2 * act_bytes * nb * (c_in + c_out) * t_hw
                   + 4 * nb * (hid_blk + c_out) * t_hw
                   + 2 * 4 * (hid * c_in + c_out * hid + hid + c_out))
    vmem_limit = int(min(max(2 * vmem_needed + (4 << 20), 32 << 20), budget))

    # TODO(synk): strict f32 parity at large C/Hid may need precision=HIGHEST
    # on the dots; default precision passes 1e-5 at these widths.
    kernel = _make_kernel(nb, hid, _HID_CHUNK)

    out3d = pl.pallas_call(
        kernel,
        out_shape=jax.ShapeDtypeStruct((n, c_out, hw), x_nchw.dtype),
        grid_spec=pltpu.PrefetchScalarGridSpec(
            num_scalar_prefetch=0,
            grid=(b_tiles, s_tiles),
            in_specs=[
                pl.BlockSpec((nb, c_in, t_hw), lambda b, s: (b, 0, s)),
                pl.BlockSpec((hid, c_in), lambda b, s: (0, 0)),
                pl.BlockSpec((hid, 1), lambda b, s: (0, 0)),
                pl.BlockSpec((c_out, hid), lambda b, s: (0, 0)),
                pl.BlockSpec((c_out, 1), lambda b, s: (0, 0)),
            ],
            out_specs=pl.BlockSpec((nb, c_out, t_hw), lambda b, s: (b, 0, s)),
        ),
        compiler_params=pltpu.CompilerParams(
            dimension_semantics=("parallel", "parallel"),
            vmem_limit_bytes=vmem_limit,
        ),
        cost_estimate=cost,
    )(x3d, w1, b1_2d, w2, b2_2d)

    return out3d.reshape(n, c_out, h, w)


def _reference(x_nchw, w1, b1, w2, b2):
    # Pure-JAX reference: 1x1 conv == channel einsum, exact-erf GELU.
    h = jnp.einsum("oc,nchw->nohw", w1, x_nchw) + b1[None, :, None, None]
    h = 0.5 * h * (1.0 + lax.erf(h * _INV_SQRT2))
    y = jnp.einsum("oh,nhxy->noxy", w2, h) + b2[None, :, None, None]
    return y


if __name__ == "__main__":
    key = jax.random.PRNGKey(0)
    N, C_IN, HID, C_OUT, H, W = 2, 4, 32, 4, 16, 16

    k_x, k_w1, k_b1, k_w2, k_b2, k_x2, k_x3 = jax.random.split(key, 7)
    x = jax.random.normal(k_x, (N, C_IN, H, W), dtype=jnp.float32)
    # PyTorch Conv2d(1x1) weight layouts with the 1x1 spatial dims squeezed:
    #   fc1.weight: (HID, C_IN, 1, 1)  -> (HID, C_IN)
    #   fc2.weight: (C_OUT, HID, 1, 1) -> (C_OUT, HID)
    w1 = jax.random.normal(k_w1, (HID, C_IN), dtype=jnp.float32) * 0.1
    b1 = jax.random.normal(k_b1, (HID,), dtype=jnp.float32) * 0.1
    w2 = jax.random.normal(k_w2, (C_OUT, HID), dtype=jnp.float32) * 0.1
    b2 = jax.random.normal(k_b2, (C_OUT,), dtype=jnp.float32) * 0.1

    out = cmlp_forward(x, w1, b1, w2, b2)
    jax.block_until_ready(out)
    ref = _reference(x, w1, b1, w2, b2)
    assert out.shape == (N, C_OUT, H, W)
    assert jnp.allclose(out, ref, atol=1e-5, rtol=1e-5)

    # Non-square-of-128 spatial extent (24*24 = 576 pixels): whole-image tile
    # uses a full-extent block, so no divisibility assert is needed.
    x2 = jax.random.normal(k_x2, (2, C_IN, 24, 24), dtype=jnp.float32)
    out2 = cmlp_forward(x2, w1, b1, w2, b2)
    jax.block_until_ready(out2)
    ref2 = _reference(x2, w1, b1, w2, b2)
    assert out2.shape == (2, C_OUT, 24, 24)
    assert jnp.allclose(out2, ref2, atol=1e-5, rtol=1e-5)

    # Odd batch (N=5): exercises batch folding (nb=3) with a clipped edge block.
    x3 = jax.random.normal(k_x3, (5, C_IN, H, W), dtype=jnp.float32)
    out3 = cmlp_forward(x3, w1, b1, w2, b2)
    jax.block_until_ready(out3)
    ref3 = _reference(x3, w1, b1, w2, b2)
    assert out3.shape == (5, C_OUT, H, W)
    assert jnp.allclose(out3, ref3, atol=1e-5, rtol=1e-5)

    print("KERNEL_OK")
</pallas_src>

<mosaic_0001>
module attributes {stable_mosaic.version = 11 : i64} {
  func.func @kernel(%arg0: i32, %arg1: i32, %arg2: memref<1x4x256xf32, #tpu.memory_space<vmem>>, %arg3: memref<32x4xf32, #tpu.memory_space<vmem>>, %arg4: memref<32x1xf32, #tpu.memory_space<vmem>>, %arg5: memref<4x32xf32, #tpu.memory_space<vmem>>, %arg6: memref<4x1xf32, #tpu.memory_space<vmem>>, %arg7: memref<1x4x256xf32, #tpu.memory_space<vmem>>) attributes {dimension_semantics = [#tpu.dimension_semantics<parallel>, #tpu.dimension_semantics<parallel>], iteration_bounds = array<i64: 2, 1>, scalar_prefetch = 0 : i64, scratch_operands = 0 : i64, tpu.core_type = #tpu.core_type<tc>, window_params = [{transform_indices = @transform_0, window_bounds = array<i64: 1, 4, 256>}, {pipeline_mode = #tpu.pipeline_mode<synchronous>, transform_indices = @transform_1, window_bounds = array<i64: 32, 4>}, {pipeline_mode = #tpu.pipeline_mode<synchronous>, transform_indices = @transform_2, window_bounds = array<i64: 32, 1>}, {pipeline_mode = #tpu.pipeline_mode<synchronous>, transform_indices = @transform_3, window_bounds = array<i64: 4, 32>}, {pipeline_mode = #tpu.pipeline_mode<synchronous>, transform_indices = @transform_4, window_bounds = array<i64: 4, 1>}, {transform_indices = @transform_5, window_bounds = array<i64: 1, 4, 256>}]} {
    %c0 = arith.constant 0 : index
    %c0_0 = arith.constant 0 : index
    %0 = vector.load %arg6[%c0, %c0_0] : memref<4x1xf32, #tpu.memory_space<vmem>>, vector<4x1xf32>
    %c0_1 = arith.constant 0 : index
    %c0_2 = arith.constant 0 : index
    %c0_3 = arith.constant 0 : index
    %1 = vector.load %arg2[%c0_1, %c0_2, %c0_3] : memref<1x4x256xf32, #tpu.memory_space<vmem>>, vector<1x4x256xf32>
    %2 = vector.shape_cast %1 : vector<1x4x256xf32> to vector<4x256xf32>
    %c0_4 = arith.constant 0 : index
    %c0_5 = arith.constant 0 : index
    %3 = vector.load %arg3[%c0_4, %c0_5] : memref<32x4xf32, #tpu.memory_space<vmem>>, vector<32x4xf32>
    %cst = arith.constant dense<0.000000e+00> : vector<32x256xf32>
    %4 = tpu.matmul %3, %2, %cst {dimension_numbers = #tpu.dot_dimension_numbers<[1], [0], [0], [1], [0, 0, 1, 1], [], []>} : vector<32x4xf32>, vector<4x256xf32>, vector<32x256xf32> -> vector<32x256xf32>
    %c0_6 = arith.constant 0 : index
    %c0_7 = arith.constant 0 : index
    %5 = vector.load %arg4[%c0_6, %c0_7] : memref<32x1xf32, #tpu.memory_space<vmem>>, vector<32x1xf32>
    %6 = vector.broadcast %5 : vector<32x1xf32> to vector<32x256xf32>
    %7 = arith.addf %4, %6 : vector<32x256xf32>
    %cst_8 = arith.constant 5.000000e-01 : f32
    %8 = vector.broadcast %cst_8 : f32 to vector<32x256xf32>
    %9 = arith.mulf %8, %7 : vector<32x256xf32>
    %cst_9 = arith.constant 0.707106769 : f32
    %10 = vector.broadcast %cst_9 : f32 to vector<32x256xf32>
    %11 = arith.mulf %7, %10 : vector<32x256xf32>
    %12 = math.erf %11 : vector<32x256xf32>
    %cst_10 = arith.constant 1.000000e+00 : f32
    %13 = vector.broadcast %cst_10 : f32 to vector<32x256xf32>
    %14 = arith.addf %13, %12 : vector<32x256xf32>
    %15 = arith.mulf %9, %14 : vector<32x256xf32>
    %c0_11 = arith.constant 0 : index
    %c0_12 = arith.constant 0 : index
    %16 = vector.load %arg5[%c0_11, %c0_12] : memref<4x32xf32, #tpu.memory_space<vmem>>, vector<4x32xf32>
    %cst_13 = arith.constant dense<0.000000e+00> : vector<4x256xf32>
    %17 = tpu.matmul %16, %15, %cst_13 {dimension_numbers = #tpu.dot_dimension_numbers<[1], [0], [0], [1], [0, 0, 1, 1], [], []>} : vector<4x32xf32>, vector<32x256xf32>, vector<4x256xf32> -> vector<4x256xf32>
    %18 = vector.broadcast %0 : vector<4x1xf32> to vector<4x256xf32>
    %19 = arith.addf %17, %18 : vector<4x256xf32>
    %c0_14 = arith.constant 0 : index
    %c0_15 = arith.constant 0 : index
    %c0_16 = arith.constant 0 : index
    %20 = vector.load %arg7[%c0_14, %c0_15, %c0_16] : memref<1x4x256xf32, #tpu.memory_space<vmem>>, vector<1x4x256xf32>
    %21 = vector.shape_cast %20 : vector<1x4x256xf32> to vector<4x256xf32>
    %22 = vector.shape_cast %19 : vector<4x256xf32> to vector<1x4x256xf32>
    tpu.vector_store %arg7[%c0_14, %c0_15, %c0_16], %22 {strides = array<i32>} : memref<1x4x256xf32, #tpu.memory_space<vmem>>, vector<1x4x256xf32>,
    return
  }
  func.func @transform_0(%arg0: i32, %arg1: i32) -> (i32, i32, i32) {
    %c0_i32 = arith.constant 0 : i32
    %c0_i32_0 = arith.constant 0 : i32
    return %arg0, %c0_i32, %arg1 : i32, i32, i32
  }
  func.func @transform_1(%arg0: i32, %arg1: i32) -> (i32, i32) {
    %c0_i32 = arith.constant 0 : i32
    %c0_i32_0 = arith.constant 0 : i32
    %c0_i32_1 = arith.constant 0 : i32
    return %c0_i32, %c0_i32_0 : i32, i32
  }
  func.func @transform_2(%arg0: i32, %arg1: i32) -> (i32, i32) {
    %c0_i32 = arith.constant 0 : i32
    %c0_i32_0 = arith.constant 0 : i32
    %c0_i32_1 = arith.constant 0 : i32
    return %c0_i32, %c0_i32_0 : i32, i32
  }
  func.func @transform_3(%arg0: i32, %arg1: i32) -> (i32, i32) {
    %c0_i32 = arith.constant 0 : i32
    %c0_i32_0 = arith.constant 0 : i32
    %c0_i32_1 = arith.constant 0 : i32
    return %c0_i32, %c0_i32_0 : i32, i32
  }
  func.func @transform_4(%arg0: i32, %arg1: i32) -> (i32, i32) {
    %c0_i32 = arith.constant 0 : i32
    %c0_i32_0 = arith.constant 0 : i32
    %c0_i32_1 = arith.constant 0 : i32
    return %c0_i32, %c0_i32_0 : i32, i32
  }
  func.func @transform_5(%arg0: i32, %arg1: i32) -> (i32, i32, i32) {
    %c0_i32 = arith.constant 0 : i32
    %c0_i32_0 = arith.constant 0 : i32
    return %arg0, %c0_i32, %arg1 : i32, i32, i32
  }
}

</mosaic_0001>

<bundles_post_ra>
// kernel: cmlp_forward.1
= control target key start
LH: loop header
LB: loop body
LE: loop exit
PB: predicated region body
PF: predicated region fallthrough
CT: control target
= control target key end

     0   :  { %s737_s18 = smov 0   ;;  %s739_s19 = smov 0   ;;  %s807_s0 = inlined_call_operand.vmem [shape: f32[2,4,256], index: 0, kind: input, shape index: {}]   ;;  %s808_s1 = inlined_call_operand.vmem [shape: f32[32,4], index: 1, kind: input, shape index: {}]   ;;  %s809_s2 = inlined_call_operand.vmem [shape: f32[32,1], index: 2, kind: input, shape index: {}]   ;;  %s810_s3 = inlined_call_operand.vmem [shape: f32[4,32], index: 3, kind: input, shape index: {}]   ;;  %s811_s4 = inlined_call_operand.vmem [shape: f32[4,1], index: 4, kind: input, shape index: {}]   ;;  %s812_s5 = inlined_call_operand.vmem [shape: f32[2,4,256], index: 5, kind: output, shape index: {}]  }
   0x1   :  { %s741_s20 = smov 0  }
   0x2 LB: > { %s27_s21 = sadd.s32 1, %s699_s19  ;;  %p620_p0 = scmp.ge.s32.totalorder %s703_s20, 1  ;;  %s703_s20 = sphi %s741_s20, %s15_s20   ;;  %s699_s19 = sphi %s739_s19, %s814_s19   ;;  %s695_s18 = sphi %s737_s18, %s813_s18  }
   0x3   : > { %p29_p1 = scmp.ge.s32.totalorder %s27_s21, 2  ;;  %p208_p2 = scmp.lt.s32.totalorder %s703_s20, 3 }
   0x5   : > { %s816_s21 = smov (%p29_p1, %s27_s21), 0  ;;  %p209_p3 = pnand %p620_p0, %p208_p2 }
   0x6   : > { %p245_p4 = scmp.lt.s32.totalorder (!%p209_p3), %s695_s18, 1 }
   0x7   : > { %212 = sbr.rel (%p209_p3) target bundleno = 458 (0x1ca), region = 40 }
   0xc   : > { %v705_v0 = vmov 0.0   ;;  %v271_v1 = vld [vmem:[%s809_s2 + $0x8] sm:$0xff]  ;;  %s818_s18 = smov (!%p245_p4, %s695_s18), 1  ;;  %v706_v2 = vmov 0   ;;  %v273_v3 = vld [vmem:[%s809_s2 + $0x18] sm:$0xff]  ;;  %v270_v4 = vld [vmem:[%s809_s2] sm:$0xff] }
   0xd   : > { %378 = vmatprep.mubr.f32.mxu0 %v705_v0  ;;  %517 = vmatprep.mubr.f32.mxu1 %v705_v0  ;;  %s634_s26 = sshll.u32 %s818_s18, 3  ;;  %v272_v5 = vld [vmem:[%s809_s2 + $0x10] sm:$0xff]  ;;  %vm309_vm0 = vcmask 1043456   ;;  %v266_v8 = vld [vmem:[%s808_s1] sm:$0xff]  ;;  %vm296_vm1 = vcmask 31744   ;;  %v267_v10 = vld [vmem:[%s808_s1 + $0x8] sm:$0xff] }
   0xe   : > { %663 = vset.pattern.permute.xlu1 %v706_v2  ;;  %662 = vset.pattern.permute.xlu0 %v706_v2  ;;  %s252_s8 = scalar_lea.vmem %s807_s0, %s634_s26  ;;  %v264_v9 = vld [vmem:[%s811_s4] sm:$0xf]  ;;  %v268_v11 = vld [vmem:[%s808_s1 + $0x10] sm:$0xff]  ;;  %v269_v12 = vld [vmem:[%s808_s1 + $0x18] sm:$0xff]  ;;  %vm449_vm2 = vcmask 261120   ;;  %s262_s28 = scalar_lea.vmem %s812_s5, %s634_s26 }
   0xf   : > { %281 = vperm.xlu1 %663, %v271_v1   ;;  %291 = vperm.xlu0 %662, %v273_v3   ;;  %v265_v6 = vld [vmem:[%s252_s8] sm:$0xff] }
  0x10   : > { %v295_v7 = vcombine.high %v265_v6, %v265_v6 }
  0x12   : > { %625 = vmatprep.subr.msk.mxu0 %vm309_vm0, %v295_v7 }
  0x13   : > { %276 = vperm.xlu1 %663, %v270_v4   ;;  %286 = vperm.xlu0 %662, %v272_v5  }
  0x14   : > { %626 = vmatpush1.msk.msra.mxu0 %vm309_vm0, %v265_v6 }
  0x15   : > { %627 = vmatmul.mubr.msk.f32.vlgmr.msra.gmra.mxu0 %vm296_vm1, %v266_v8 }
  0x16   : > { %384 = vmatprep.mubr.f32.mxu0 %v705_v0 }
  0x17   : > { %446 = vperm.xlu0 %662, %v264_v9   ;;  %v443_v9 = vld [vmem:[%s810_s3] sm:$0xf] }
  0x19   : > { %628 = vmatmul.mubr.msk.f32.gmra.mxu0 %vm296_vm1, %v267_v10 }
  0x1a   : > { %390 = vmatprep.mubr.f32.mxu0 %v705_v0 }
  0x1d   : > { %629 = vmatmul.mubr.msk.f32.gmra.mxu0 %vm296_vm1, %v268_v11 }
  0x1e   : > { %396 = vmatprep.mubr.f32.mxu0 %v705_v0 }
  0x21   : > { %630 = vmatmul.mubr.msk.f32.gmra.mxu0 %vm296_vm1, %v269_v12 }
  0x8a   : > { %v292_v14 = vpop.permute.xlu0 %291  ;;  %v282_v17 = vpop.permute.xlu1 %281 }
  0x8e   : > { %v287_v20 = vpop.permute.xlu0 %286  ;;  %v277_v24 = vpop.permute.xlu1 %276 }
  0x92   : > { %v447_v11 = vpop.permute.xlu0 %446 }
  0xd5   : > { %v380_v13 = vpop.f32.mrf.mxu0 }
  0xd6   : > { %v381_v32 = vadd.f32 %v380_v13, %v277_v24 }
  0xd7   : > { %v382_v15 = vpop.f32.mrf.mxu0 }
  0xd8   : > { %v383_v29 = vadd.f32 %v382_v15, %v277_v24  ;;  %v411_v40 = vmul.f32 0.70710677, %v381_v32  ;;  %v403_v5 = vmul.f32 0.5, %v381_v32 }
  0xd9   : > { %v386_v16 = vpop.f32.mrf.mxu0 }
  0xda   : > { %v387_v27 = vadd.f32 %v386_v16, %v282_v17  ;;  %v412_v38 = vmul.f32 0.70710677, %v383_v29  ;;  %v404_v3 = vmul.f32 0.5, %v383_v29 }
  0xdb   : > { %v388_v18 = vpop.f32.mrf.mxu0 }
  0xdc   : > { %v389_v19 = vadd.f32 %v388_v18, %v282_v17  ;;  %v413_v37 = vmul.f32 0.70710677, %v387_v27  ;;  %v405_v0 = vmul.f32 0.5, %v387_v27 }
  0xdd   : > { %v392_v21 = vpop.f32.mrf.mxu0 }
  0xde   : > { %v393_v22 = vadd.f32 %v392_v21, %v287_v20  ;;  %v414_v25 = vmul.f32 0.70710677, %v389_v19  ;;  %v406_v61 = vmul.f32 0.5, %v389_v19 }
  0xdf   : > { %v394_v23 = vpop.f32.mrf.mxu0 }
  0xe0   : > { %v395_v26 = vadd.f32 %v394_v23, %v287_v20  ;;  %v415_v33 = vmul.f32 0.70710677, %v393_v22  ;;  %665 = verf.f32 %v414_v25  ;;  %v407_v58 = vmul.f32 0.5, %v393_v22 }
  0xe1   : > { %v398_v28 = vpop.f32.mrf.mxu0 }
  0xe2   : > { %v416_v30 = vmul.f32 0.70710677, %v395_v26  ;;  %v399_v31 = vadd.f32 %v398_v28, %v292_v14  ;;  %v408_v55 = vmul.f32 0.5, %v395_v26 }
  0xe3   : > { %v400_v34 = vpop.f32.mrf.mxu0 }
  0xe4   : > { %v417_v35 = vmul.f32 0.70710677, %v399_v31  ;;  %v401_v36 = vadd.f32 %v400_v34, %v292_v14  ;;  %667 = verf.f32 %v416_v30  ;;  %v409_v52 = vmul.f32 0.5, %v399_v31 }
  0xe6   : > { %669 = verf.f32 %v417_v35  ;;  %v418_v39 = vmul.f32 0.70710677, %v401_v36  ;;  %v410_v48 = vmul.f32 0.5, %v401_v36 }
  0xe7   : > { %671 = verf.f32 %v415_v33 }
  0xe8   : > { %673 = verf.f32 %v418_v39 }
  0xe9   : > { %675 = verf.f32 %v413_v37 }
  0xea   : > { %677 = verf.f32 %v412_v38 }
  0xeb   : > { %679 = verf.f32 %v411_v40 }
  0xed   : > { %v666_v41 = vpop.eup %665 }
  0xee   : > { %v430_v57 = vadd.f32 1.0, %v666_v41 }
  0xf0   : > { %v438_v4 = vmul.f32 %v430_v57, %v406_v61 }
  0xf1   : > { %v668_v42 = vpop.eup %667 }
  0xf2   : > { %v432_v50 = vadd.f32 1.0, %v668_v42 }
  0xf3   : > { %v670_v43 = vpop.eup %669 }
  0xf4   : > { %v672_v44 = vpop.eup %671  ;;  %v433_v46 = vadd.f32 1.0, %v670_v43  ;;  %v440_v62 = vmul.f32 %v432_v50, %v408_v55 }
  0xf5   : > { %v674_v45 = vpop.eup %673  ;;  %v431_v53 = vadd.f32 1.0, %v672_v44 }
  0xf6   : > { %v676_v47 = vpop.eup %675  ;;  %v434_v49 = vadd.f32 1.0, %v674_v45  ;;  %v441_v59 = vmul.f32 %v433_v46, %v409_v52 }
  0xf7   : > { %v678_v51 = vpop.eup %677  ;;  %v429_v60 = vadd.f32 1.0, %v676_v47  ;;  %v439_v1 = vmul.f32 %v431_v53, %v407_v58 }
  0xf8   : > { %v680_v54 = vpop.eup %679  ;;  %v442_v56 = vmul.f32 %v434_v49, %v410_v48  ;;  %v428_v63 = vadd.f32 1.0, %v678_v51 }
  0xf9   : > { %v427_v2 = vadd.f32 1.0, %v680_v54  ;;  %v437_v6 = vmul.f32 %v429_v60, %v405_v0 }
  0xfa   : > { %477 = vmatprep.subr.mxu1 %v442_v56  ;;  %v436_v7 = vmul.f32 %v428_v63, %v404_v3 }
  0xfb   : > { %478 = vmatpush1.msra.mxu1 %v441_v59  ;;  %v435_v8 = vmul.f32 %v427_v2, %v403_v5 }
  0xfc   : > { %479 = vmatprep.subr.mxu1 %v440_v62 }
  0xfd   : > { %480 = vmatpush1.msra.mxu1 %v439_v1 }
  0xfe   : > { %481 = vmatprep.subr.mxu1 %v438_v4 }
  0xff   : > { %482 = vmatpush1.msra.mxu1 %v437_v6 }
 0x100   : > { %483 = vmatprep.subr.mxu1 %v436_v7 }
 0x101   : > { %484 = vmatpush1.msra.mxu1 %v435_v8 }
 0x102   : > { %631 = vmatmul.mubr.msk.f32.vlgmr.msra.gmra.mxu1 %vm449_vm2, %v443_v9 }
 0x1c2   : > { %v519_v10 = vpop.f32.mrf.mxu1 }
 0x1c3   : > { %v520_v13 = vadd.f32 %v519_v10, %v447_v11 }
 0x1c4   : > { %v521_v12 = vpop.f32.mrf.mxu1 }
 0x1c5   : > { %v522_v14 = vadd.f32 %v521_v12, %v447_v11 }
 0x1c7   : > { %v526_v15 = vcombine.low %v520_v13, %v522_v14 }
 0x1c9   : > { %528 = vst [vmem:[%s262_s28] sm:$0xff] %v526_v15 }
 0x1ca PF: > { %s15_s20 = sadd.s32 1, %s703_s20   ;;  %s813_s18 = smov %s699_s19 }
 0x1cb   : > { %p12_p5 = scmp.ge.s32.totalorder %s15_s20, 4   ;;  %s814_s19 = smov %s816_s21 }
 0x1cd   :  { %14 = sbr.rel (!%p12_p5) target bundleno = 2 (0x2), region = 70 }

</bundles_post_ra>
